<compile_context>
chip_gen: v7x
topology: tpu7x:2x2x1
jax: 0.10.0
libtpu: 0.0.40
codegen_flags: <defaults>
</compile_context>

<pallas_src>
import jax
import jax.numpy as jnp
from jax import lax
from jax.experimental import pallas as pl
from jax.experimental.pallas import tpu as pltpu


def _linear_kernel(w_ref, b_ref, x_ref, o_ref):
    # w_ref: (C, D)   nn.Linear weight in native layout, VMEM-resident
    # b_ref: (C, 1)   f32 bias column, VMEM-resident
    # x_ref: (1, T, D) token tile
    # o_ref: (1, C, T) channels-first output tile (token axis = lane axis)
    x = x_ref[0]                                             # (T, D)
    # MK,NK contraction (lhs contracts on its last dim, rhs contracts on its
    # last dim == transpose_rhs).  Same dimension_numbers as q @ k^T in the
    # flash-attention TPU kernel: lowered natively on the MXU, no XLU pass.
    y = lax.dot_general(
        w_ref[...], x,
        dimension_numbers=(((1,), (1,)), ((), ())),
        preferred_element_type=jnp.float32)                  # (C, T) f32
    o_ref[0] = (y + b_ref[...]).astype(o_ref.dtype)


def _pick_token_tile(HW, max_tile=1024):
    """Pick a lane-dense token tile (always a multiple of 128).

    Returns (T, HW_pad): T divides HW_pad, HW_pad >= HW.
    """
    max_tile = max(128, (int(max_tile) // 128) * 128)
    if HW % 128 == 0:
        best = 128
        t = 256
        while t <= min(HW, max_tile):
            if HW % t == 0:
                best = t
            t += 128
        return best, HW
    hw_pad128 = -(-HW // 128) * 128
    if hw_pad128 <= max_tile:
        return hw_pad128, hw_pad128            # one lane-dense tile per batch row
    # Choose the multiple-of-128 tile <= max_tile that wastes the least padding,
    # preferring larger tiles on ties (fewer grid steps to amortize overhead).
    best_t, best_pad = 128, -(-HW // 128) * 128
    t = 256
    while t <= max_tile:
        pad = -(-HW // t) * t
        if pad <= best_pad:
            best_t, best_pad = t, pad
        t += 128
    return best_t, best_pad


def decoder_linear_head(x, weight, bias, *, out_dtype=None, token_tile=None,
                        max_token_tile=1024, vmem_limit_bytes=32 * 1024 * 1024):
    """y[b, c, hw] = sum_d x[b, hw, d] * weight[c, d] + bias[c].

    x:      (B, HW, D) -- consumed in its own dtype.  Pass bf16 straight from a
            bf16-emitting producer to halve the read traffic; do NOT cast here
            (a materialized cast would add an extra HBM round trip).
    weight: (C, D)  (PyTorch nn.Linear layout);  bias: (C,).
    Returns (B, C, HW) channels-first, token axis last (lane-dense).
    """
    B, HW, D = x.shape
    C = weight.shape[0]
    out_dtype = x.dtype if out_dtype is None else out_dtype

    weight = weight.astype(x.dtype)              # tiny; matches MXU operand dtypes
    bias2 = bias.astype(jnp.float32).reshape(C, 1)

    if token_tile is not None:
        T = int(token_tile)
        HW_pad = -(-HW // T) * T
    else:
        T, HW_pad = _pick_token_tile(HW, max_token_tile)
    if HW_pad != HW:
        # Zero-pad tokens so every output store is a full, unmasked 128-lane tile.
        x = jnp.pad(x, ((0, 0), (0, HW_pad - HW), (0, 0)))
    n_t = HW_pad // T

    in_b = jnp.dtype(x.dtype).itemsize
    w_b = jnp.dtype(weight.dtype).itemsize
    out_b = jnp.dtype(out_dtype).itemsize
    cost = pl.CostEstimate(
        flops=2 * B * HW_pad * D * C,
        transcendentals=0,
        bytes_accessed=(B * HW_pad * D * in_b + C * D * w_b + C * 4
                        + B * HW_pad * C * out_b),
    )

    out = pl.pallas_call(
        _linear_kernel,
        out_shape=jax.ShapeDtypeStruct((B, C, HW_pad), out_dtype),
        grid_spec=pltpu.PrefetchScalarGridSpec(
            num_scalar_prefetch=0,
            grid=(B, n_t),
            in_specs=[
                pl.BlockSpec((C, D), lambda b, t: (0, 0)),        # weight (VMEM-resident)
                pl.BlockSpec((C, 1), lambda b, t: (0, 0)),        # bias   (VMEM-resident)
                pl.BlockSpec((1, T, D), lambda b, t: (b, t, 0)),  # x tile
            ],
            out_specs=pl.BlockSpec((1, C, T), lambda b, t: (b, 0, t)),
        ),
        compiler_params=pltpu.CompilerParams(
            dimension_semantics=("parallel", "parallel"),
            vmem_limit_bytes=vmem_limit_bytes,
        ),
        cost_estimate=cost,
    )(weight, bias2, x)

    if HW_pad != HW:
        out = out[:, :, :HW]
    return out


def decoder_linear_forward(x, im_size, patch_size, weight, bias, *,
                           out_dtype=None, token_tile=None,
                           max_token_tile=1024,
                           vmem_limit_bytes=32 * 1024 * 1024):
    """Full DecoderLinear.forward semantics.

    x: (B, HW, d_encoder); im_size = (H, W).
    Returns (B, n_cls, GS, HW // GS) -- matches PyTorch's
    x.view(B, GS, HW // GS, C).permute(0, 3, 1, 2).
    """
    H, W = im_size
    GS = H // patch_size
    y = decoder_linear_head(x, weight, bias, out_dtype=out_dtype,
                            token_tile=token_tile,
                            max_token_tile=max_token_tile,
                            vmem_limit_bytes=vmem_limit_bytes)   # (B, C, HW)
    B, C, HW = y.shape
    # The permute is already fused into the kernel (channels-first output);
    # this reshape is a pure row-major view: y[b, c, g*W' + w] == out[b, c, g, w].
    return y.reshape(B, C, GS, HW // GS)


def _trunc_normal(key, shape, std=0.02, dtype=jnp.float32):
    # Matches torch.nn.init.trunc_normal_ defaults (truncation at +/- 2 std).
    return std * jax.random.truncated_normal(key, -2.0, 2.0, shape, dtype)


def _reference(x, weight, bias, H, W, patch_size):
    B, HW, D = x.shape
    C = weight.shape[0]
    GS = H // patch_size
    y = jnp.einsum("bsd,cd->bsc", x.astype(jnp.float32),
                   weight.astype(jnp.float32)) + bias.astype(jnp.float32)
    return jnp.transpose(y.reshape(B, GS, HW // GS, C), (0, 3, 1, 2))


if __name__ == "__main__":
    # Module config (small, consistent with DecoderLinear.forward):
    n_cls, patch_size, d_encoder = 16, 4, 32
    B, H, W = 2, 64, 64
    GS = H // patch_size                       # 16
    HW = GS * (W // patch_size)                # 256 tokens (multiple of 128)

    key = jax.random.PRNGKey(0)
    k_x, k_w, k_x2 = jax.random.split(key, 3)

    x = jax.random.normal(k_x, (B, HW, d_encoder), dtype=jnp.float32)
    # init_weights: Linear.weight ~ trunc_normal(std=0.02), Linear.bias = 0.
    weight = _trunc_normal(k_w, (n_cls, d_encoder), std=0.02)
    bias = jnp.zeros((n_cls,), dtype=jnp.float32)

    ref = _reference(x, weight, bias, H, W, patch_size)

    # f32 path (strict numerical check; HW % 128 == 0 -> no padding, unmasked stores).
    out = decoder_linear_forward(x, (H, W), patch_size, weight, bias)
    out = jax.block_until_ready(out)
    assert out.shape == (B, n_cls, GS, HW // GS)
    assert jnp.allclose(out, ref, atol=1e-5, rtol=1e-5)

    # bf16 producer + bf16 output: halves both read- and write-side HBM traffic;
    # accumulation stays f32 on the MXU.
    x_bf16 = x.astype(jnp.bfloat16)            # stands in for a bf16-emitting producer
    out_bf16 = decoder_linear_forward(x_bf16, (H, W), patch_size, weight, bias,
                                      out_dtype=jnp.bfloat16)
    out_bf16 = jax.block_until_ready(out_bf16)
    assert out_bf16.dtype == jnp.bfloat16
    assert jnp.allclose(out_bf16.astype(jnp.float32), ref, atol=3e-2, rtol=3e-2)

    # Token count that is NOT a multiple of 128 -> exercises the zero-pad + slice path.
    H2 = W2 = 32
    GS2 = H2 // patch_size                     # 8
    HW2 = GS2 * (W2 // patch_size)             # 64 tokens
    x2 = jax.random.normal(k_x2, (B, HW2, d_encoder), dtype=jnp.float32)
    ref2 = _reference(x2, weight, bias, H2, W2, patch_size)
    out2 = decoder_linear_forward(x2, (H2, W2), patch_size, weight, bias)
    out2 = jax.block_until_ready(out2)
    assert out2.shape == (B, n_cls, GS2, HW2 // GS2)
    assert jnp.allclose(out2, ref2, atol=1e-5, rtol=1e-5)

    print("KERNEL_OK")
</pallas_src>

<mosaic_0001>
module attributes {stable_mosaic.version = 11 : i64} {
  func.func @_linear_kernel(%arg0: i32, %arg1: i32, %arg2: memref<16x32xf32, #tpu.memory_space<vmem>>, %arg3: memref<16x1xf32, #tpu.memory_space<vmem>>, %arg4: memref<1x256x32xf32, #tpu.memory_space<vmem>>, %arg5: memref<1x16x256xf32, #tpu.memory_space<vmem>>) attributes {dimension_semantics = [#tpu.dimension_semantics<parallel>, #tpu.dimension_semantics<parallel>], iteration_bounds = array<i64: 2, 1>, scalar_prefetch = 0 : i64, scratch_operands = 0 : i64, tpu.core_type = #tpu.core_type<tc>, window_params = [{pipeline_mode = #tpu.pipeline_mode<synchronous>, transform_indices = @transform_0, window_bounds = array<i64: 16, 32>}, {pipeline_mode = #tpu.pipeline_mode<synchronous>, transform_indices = @transform_1, window_bounds = array<i64: 16, 1>}, {transform_indices = @transform_2, window_bounds = array<i64: 1, 256, 32>}, {transform_indices = @transform_3, window_bounds = array<i64: 1, 16, 256>}]} {
    %c0 = arith.constant 0 : index
    %c0_0 = arith.constant 0 : index
    %c0_1 = arith.constant 0 : index
    %0 = vector.load %arg4[%c0, %c0_0, %c0_1] : memref<1x256x32xf32, #tpu.memory_space<vmem>>, vector<1x256x32xf32>
    %1 = vector.shape_cast %0 : vector<1x256x32xf32> to vector<256x32xf32>
    %c0_2 = arith.constant 0 : index
    %c0_3 = arith.constant 0 : index
    %2 = vector.load %arg2[%c0_2, %c0_3] : memref<16x32xf32, #tpu.memory_space<vmem>>, vector<16x32xf32>
    %cst = arith.constant dense<0.000000e+00> : vector<16x256xf32>
    %3 = tpu.matmul %2, %1, %cst {dimension_numbers = #tpu.dot_dimension_numbers<[1], [1], [0], [0], [0, 0, 1, 0], [], []>} : vector<16x32xf32>, vector<256x32xf32>, vector<16x256xf32> -> vector<16x256xf32>
    %c0_4 = arith.constant 0 : index
    %c0_5 = arith.constant 0 : index
    %4 = vector.load %arg3[%c0_4, %c0_5] : memref<16x1xf32, #tpu.memory_space<vmem>>, vector<16x1xf32>
    %5 = vector.broadcast %4 : vector<16x1xf32> to vector<16x256xf32>
    %6 = arith.addf %3, %5 : vector<16x256xf32>
    %c0_6 = arith.constant 0 : index
    %c0_7 = arith.constant 0 : index
    %c0_8 = arith.constant 0 : index
    %7 = vector.load %arg5[%c0_6, %c0_7, %c0_8] : memref<1x16x256xf32, #tpu.memory_space<vmem>>, vector<1x16x256xf32>
    %8 = vector.shape_cast %7 : vector<1x16x256xf32> to vector<16x256xf32>
    %9 = vector.shape_cast %6 : vector<16x256xf32> to vector<1x16x256xf32>
    tpu.vector_store %arg5[%c0_6, %c0_7, %c0_8], %9 {strides = array<i32>} : memref<1x16x256xf32, #tpu.memory_space<vmem>>, vector<1x16x256xf32>,
    return
  }
  func.func @transform_0(%arg0: i32, %arg1: i32) -> (i32, i32) {
    %c0_i32 = arith.constant 0 : i32
    %c0_i32_0 = arith.constant 0 : i32
    %c0_i32_1 = arith.constant 0 : i32
    return %c0_i32, %c0_i32_0 : i32, i32
  }
  func.func @transform_1(%arg0: i32, %arg1: i32) -> (i32, i32) {
    %c0_i32 = arith.constant 0 : i32
    %c0_i32_0 = arith.constant 0 : i32
    %c0_i32_1 = arith.constant 0 : i32
    return %c0_i32, %c0_i32_0 : i32, i32
  }
  func.func @transform_2(%arg0: i32, %arg1: i32) -> (i32, i32, i32) {
    %c0_i32 = arith.constant 0 : i32
    %c0_i32_0 = arith.constant 0 : i32
    return %arg0, %arg1, %c0_i32 : i32, i32, i32
  }
  func.func @transform_3(%arg0: i32, %arg1: i32) -> (i32, i32, i32) {
    %c0_i32 = arith.constant 0 : i32
    %c0_i32_0 = arith.constant 0 : i32
    return %arg0, %c0_i32, %arg1 : i32, i32, i32
  }
}

</mosaic_0001>

<bundles_post_ra>
// kernel: tpu_custom_call.1
= control target key start
LH: loop header
LB: loop body
LE: loop exit
PB: predicated region body
PF: predicated region fallthrough
CT: control target
= control target key end

     0   :  { %8 = vsyncpa [#allocation3], 0  ;;  %s1080_s0 = inlined_call_operand.vmem [shape: f32[16,32], index: 0, kind: input, shape index: {}]   ;;  %s1081_s1 = inlined_call_operand.vmem [shape: f32[16,1], index: 1, kind: input, shape index: {}]   ;;  %s1082_s2 = inlined_call_operand.vmem [shape: f32[2,256,32], index: 2, kind: input, shape index: {}]   ;;  %s1083_s3 = inlined_call_operand.hbm [shape: f32[2,16,256], index: 3, kind: output, shape index: {}]  }
   0x1   :  { %10 = vsyncpa [#allocation3 + $0x1], 0  ;;  %s837_s12 = smov 0   ;;  %s839_s13 = smov 0  }
   0x2   :  { %s841_s14 = smov 0   ;;  %s843_s15 = smov 0  }
   0x3   :  { %s845_s16 = smov 0   ;;  %s847_s17 = smov 0  }
   0x4 LB: > { %s525_s18 = sadd.s32 4294967295, %s811_s17   ;;  %s526_s19 = sadd.s32 4294967294, %s811_s17   ;;  %s811_s17 = sphi %s847_s17, %s16_s17   ;;  %s807_s16 = sphi %s845_s16, %s1092_s16   ;;  %s803_s15 = sphi %s843_s15, %s1091_s15   ;;  %s799_s14 = sphi %s841_s14, %s1090_s14   ;;  %s795_s13 = sphi %s839_s13, %s1089_s13   ;;  %s791_s12 = sphi %s837_s12, %s1088_s12  }
   0x5   : > { %s28_s20 = sadd.s32 1, %s807_s16  ;;  %s107_s21 = sadd.s32 1, %s799_s14 }
   0x6   : > { %p30_p0 = scmp.ge.s32.totalorder %s28_s20, 2  ;;  %p117_p1 = scmp.ne.s32.totalorder %s799_s14, %s795_s13 }
   0x7   : > { %p118_p2 = scmp.eq.s32.totalorder %s525_s18, 1  ;;  %p123_p3 = scmp.ne.s32.totalorder %s795_s13, %s791_s12 }
   0x8   : > { %s1094_s20 = smov (%p30_p0, %s28_s20), 0  ;;  %p124_p5 = scmp.eq.s32.totalorder %s526_s19, 1 }
   0x9   : > { %p877_p4 = por %p118_p2, %p117_p1  ;;  %s102_s23 = ssub.s32 %s807_s16, %s1094_s20 }
   0xa   : > { %p529_p6 = scmp.ge.s32.totalorder %s811_s17, 1  ;;  %p105_p7 = scmp.eq.s32.totalorder %s102_s23, 0 }
   0xb   : > { %p884_p8 = por %p124_p5, %p123_p3  ;;  %p161_p9 = scmp.lt.s32.totalorder %s811_s17, 3 }
   0xc   : > { %s890_s25 = scalar_select %p105_p7, %s799_s14, %s107_s21  }
   0xd   : > { %p162_p10 = pnand %p529_p6, %p161_p9 }
   0xe   : > { %p190_p11 = scmp.lt.s32.totalorder (!%p162_p10), %s803_s15, 1  ;;  %vm246_vm0 = vcmask (!%p162_p10), 261120   ;;  %v896_v0 = vld [vmem:[%s1080_s0] sm:$0xff] (!%p162_p10)  ;;  %v901_v1 = vld [vmem:[%s1080_s0 + $0x8] sm:$0xff] (!%p162_p10)  ;;  %v813_v3 = vmov (!%p162_p10), 0   ;;  %s186_s18 = sand.u32 (!%p162_p10), 1, %s795_s13  }
   0xf   : > { %165 = sbr.rel (%p162_p10) target bundleno = 323 (0x143), region = 32  ;;  %v234_v2 = vld [vmem:[%s1081_s1] sm:$0xff] (!%p162_p10)  ;;  %606 = vmatprep.mubr.msk.f32.mxu0 (!%p162_p10), %vm246_vm0, %v896_v0  ;;  %608 = vmatprep.mubr.msk.f32.mxu1 (!%p162_p10), %vm246_vm0, %v901_v1  ;;  %v235_v4 = vld [vmem:[%s1081_s1 + $0x8] sm:$0xff] (!%p162_p10)  ;;  %vm921_vm1 = vmpackc.low (!%p162_p10), %vm246_vm0, %vm246_vm0  ;;  %s530_s19 = sshll.u32 (!%p162_p10), %s186_s18, 5 }
  0x10   : > { %732 = vset.pattern.permute.xlu0 (!%p162_p10), %v813_v3  ;;  %s188_s21 = scalar_lea.vmem (!%p162_p10), [#allocation2], %s530_s19  ;;  %s573_s26 = sshll.u32 (!%p162_p10), %s803_s15, 9 }
  0x11   : > { %238 = vperm.xlu0 (!%p162_p10), %732, %v234_v2   ;;  %s446_s23 = sshll.u32 (!%p162_p10), %s188_s21, 4  ;;  %s1032_s29 = scalar_lea.hbm (!%p162_p10), %s1083_s3, %s573_s26  ;;  %s1027_s23 = int_to_ptr.vmem [resolvable:$true] %s446_s23 }
  0x12   : > { %s733_s30 = scalar_lea.vmem (!%p162_p10), %s1027_s23, 512  ;;  %s814_s4 = smov (!%p162_p10), [#allocation2]  }
  0x13   : > { %p734_p12 = scmp.ne.s32.totalorder (!%p162_p10), %s1027_s23, %s733_s30 }
  0x15   : > { %243 = vperm.xlu0 (!%p162_p10), %732, %v235_v4   ;;  %p735_p13 = pnand (!%p162_p10), %p734_p12, %p877_p4 }
  0x16   : > { %s191_s5 = scalar_select %p190_p11, %s803_s15, 1 }
  0x17   : > { %s1034_s15 = scalar_lea.sflag [#allocation3], %s186_s18  ;;  %p736_p0 = pneg %p735_p13 }
  0x18   : > { %s572_s6 = sshll.u32 %s191_s5, 8  ;;  %s737_s5 = sshll.u32 %s814_s4, 4  ;;  %s738_s5 = int_to_ptr.vmem [resolvable:$false] %s737_s5 }
  0x19   : > { %s917_s11 = scalar_lea.vmem %s1082_s2, %s572_s6  ;;  %s739_s6 = scalar_lea.vmem %s738_s5, 1024 }
  0x1a   : > { %v216_v6 = vld [vmem:[%s917_s11 + $0x80] sm:$0xff]  ;;  %v217_v7 = vld [vmem:[%s917_s11 + $0x88] sm:$0xff]  ;;  %v218_v11 = vld [vmem:[%s917_s11 + $0x90] sm:$0xff]  ;;  %p740_p1 = scmp.lt.s32.totalorder %s1027_s23, %s738_s5  ;;  %p741_p2 = scmp.lt.s32.totalorder %s739_s6, %s733_s30 }
  0x1b   : > { %v200_v8 = vld [vmem:[%s917_s11] sm:$0xff]  ;;  %v610_v9 = vpack.c.bf16 %v217_v7, %v216_v6  ;;  %v201_v10 = vld [vmem:[%s917_s11 + $0x8] sm:$0xff]  ;;  %v219_v12 = vld [vmem:[%s917_s11 + $0x98] sm:$0xff] }
  0x1c   : > { %v613_v13 = vpack.c.bf16 %v201_v10, %v200_v8  ;;  %v616_v14 = vpack.c.bf16 %v219_v12, %v218_v11  ;;  %v202_v15 = vld [vmem:[%s917_s11 + $0x10] sm:$0xff]  ;;  %v203_v16 = vld [vmem:[%s917_s11 + $0x18] sm:$0xff]  ;;  %v220_v17 = vld [vmem:[%s917_s11 + $0xa0] sm:$0xff]  ;;  %p742_p3 = por %p741_p2, %p740_p1 }
  0x1d   : > { %612 = vmatprep.subr.msk.bf16.mxu0 %vm921_vm1, %v610_v9  ;;  %658 = vmatprep.subr.msk.bf16.mxu1 %vm921_vm1, %v610_v9  ;;  %v221_v18 = vld [vmem:[%s917_s11 + $0xa8] sm:$0xff]  ;;  %v619_v19 = vpack.c.bf16 %v203_v16, %v202_v15  ;;  %v204_v21 = vld [vmem:[%s917_s11 + $0x20] sm:$0xff]  ;;  %v222_v23 = vld [vmem:[%s917_s11 + $0xb0] sm:$0xff] }
  0x1e   : > { %615 = vmatpush3.bf16.xpose.msk.msra.mxu0 %vm921_vm1, %v613_v13  ;;  %666 = vmatpush3.bf16.xpose.msk.msra.mxu1 %vm921_vm1, %v613_v13  ;;  %v622_v20 = vpack.c.bf16 %v221_v18, %v220_v17  ;;  %v205_v22 = vld [vmem:[%s917_s11 + $0x28] sm:$0xff]  ;;  %v223_v24 = vld [vmem:[%s917_s11 + $0xb8] sm:$0xff]  ;;  %v206_v27 = vld [vmem:[%s917_s11 + $0x30] sm:$0xff]  ;;  %p743_p5 = pnand %p742_p3, %p736_p0 }
  0x1f   : > { %618 = vmatprep.subr.msk.bf16.mxu0 %vm921_vm1, %v616_v14  ;;  %659 = vmatprep.subr.msk.bf16.mxu1 %vm921_vm1, %v616_v14  ;;  %v625_v25 = vpack.c.bf16 %v205_v22, %v204_v21  ;;  %v628_v26 = vpack.c.bf16 %v223_v24, %v222_v23  ;;  %v207_v28 = vld [vmem:[%s917_s11 + $0x38] sm:$0xff]  ;;  %v224_v29 = vld [vmem:[%s917_s11 + $0xc0] sm:$0xff]  ;;  %v225_v30 = vld [vmem:[%s917_s11 + $0xc8] sm:$0xff] }
  0x20   : > { %v631_v31 = vpack.c.bf16 %v207_v28, %v206_v27  ;;  %v634_v32 = vpack.c.bf16 %v225_v30, %v224_v29  ;;  %v208_v33 = vld [vmem:[%s917_s11 + $0x40] sm:$0xff]  ;;  %v209_v34 = vld [vmem:[%s917_s11 + $0x48] sm:$0xff]  ;;  %v226_v35 = vld [vmem:[%s917_s11 + $0xd0] sm:$0xff] }
  0x21   : > { %v227_v36 = vld [vmem:[%s917_s11 + $0xd8] sm:$0xff]  ;;  %v637_v37 = vpack.c.bf16 %v209_v34, %v208_v33  ;;  %v210_v39 = vld [vmem:[%s917_s11 + $0x50] sm:$0xff]  ;;  %v228_v41 = vld [vmem:[%s917_s11 + $0xe0] sm:$0xff] }
  0x22   : > { %v640_v38 = vpack.c.bf16 %v227_v36, %v226_v35  ;;  %v211_v40 = vld [vmem:[%s917_s11 + $0x58] sm:$0xff]  ;;  %v229_v42 = vld [vmem:[%s917_s11 + $0xe8] sm:$0xff]  ;;  %v212_v45 = vld [vmem:[%s917_s11 + $0x60] sm:$0xff] }
  0x23   : > { %v643_v43 = vpack.c.bf16 %v211_v40, %v210_v39  ;;  %v646_v44 = vpack.c.bf16 %v229_v42, %v228_v41  ;;  %v213_v46 = vld [vmem:[%s917_s11 + $0x68] sm:$0xff]  ;;  %v230_v47 = vld [vmem:[%s917_s11 + $0xf0] sm:$0xff]  ;;  %v231_v48 = vld [vmem:[%s917_s11 + $0xf8] sm:$0xff] }
  0x24   : > { %v649_v49 = vpack.c.bf16 %v213_v46, %v212_v45  ;;  %v652_v50 = vpack.c.bf16 %v231_v48, %v230_v47  ;;  %v214_v51 = vld [vmem:[%s917_s11 + $0x70] sm:$0xff]  ;;  %v215_v52 = vld [vmem:[%s917_s11 + $0x78] sm:$0xff] }
  0x25   : > { %v655_v53 = vpack.c.bf16 %v215_v52, %v214_v51 }
  0x26   : > { %621 = vmatpush3.bf16.xpose.msk.msra.mxu0 %vm921_vm1, %v619_v19  ;;  %667 = vmatpush3.bf16.xpose.msk.msra.mxu1 %vm921_vm1, %v619_v19 }
  0x27   : > { %624 = vmatprep.subr.msk.bf16.mxu0 %vm921_vm1, %v622_v20  ;;  %660 = vmatprep.subr.msk.bf16.mxu1 %vm921_vm1, %v622_v20 }
  0x2e   : > { %627 = vmatpush3.bf16.xpose.msk.msra.mxu0 %vm921_vm1, %v625_v25  ;;  %668 = vmatpush3.bf16.xpose.msk.msra.mxu1 %vm921_vm1, %v625_v25 }
  0x2f   : > { %630 = vmatprep.subr.msk.bf16.mxu0 %vm921_vm1, %v628_v26  ;;  %661 = vmatprep.subr.msk.bf16.mxu1 %vm921_vm1, %v628_v26 }
  0x36   : > { %633 = vmatpush3.bf16.xpose.msk.msra.mxu0 %vm921_vm1, %v631_v31  ;;  %669 = vmatpush3.bf16.xpose.msk.msra.mxu1 %vm921_vm1, %v631_v31 }
  0x37   : > { %636 = vmatprep.subr.msk.bf16.mxu0 %vm921_vm1, %v634_v32  ;;  %662 = vmatprep.subr.msk.bf16.mxu1 %vm921_vm1, %v634_v32 }
  0x3e   : > { %639 = vmatpush3.bf16.xpose.msk.msra.mxu0 %vm921_vm1, %v637_v37  ;;  %670 = vmatpush3.bf16.xpose.msk.msra.mxu1 %vm921_vm1, %v637_v37 }
  0x3f   : > { %642 = vmatprep.subr.msk.bf16.mxu0 %vm921_vm1, %v640_v38  ;;  %663 = vmatprep.subr.msk.bf16.mxu1 %vm921_vm1, %v640_v38 }
  0x46   : > { %645 = vmatpush3.bf16.xpose.msk.msra.mxu0 %vm921_vm1, %v643_v43  ;;  %671 = vmatpush3.bf16.xpose.msk.msra.mxu1 %vm921_vm1, %v643_v43 }
  0x47   : > { %648 = vmatprep.subr.msk.bf16.mxu0 %vm921_vm1, %v646_v44  ;;  %664 = vmatprep.subr.msk.bf16.mxu1 %vm921_vm1, %v646_v44 }
  0x4e   : > { %651 = vmatpush3.bf16.xpose.msk.msra.mxu0 %vm921_vm1, %v649_v49  ;;  %672 = vmatpush3.bf16.xpose.msk.msra.mxu1 %vm921_vm1, %v649_v49 }
  0x4f   : > { %654 = vmatprep.subr.msk.bf16.mxu0 %vm921_vm1, %v652_v50  ;;  %665 = vmatprep.subr.msk.bf16.mxu1 %vm921_vm1, %v652_v50 }
  0x56   : > { %657 = vmatpush3.bf16.xpose.msk.msra.mxu0 %vm921_vm1, %v655_v53  ;;  %673 = vmatpush3.bf16.xpose.msk.msra.mxu1 %vm921_vm1, %v655_v53 }
  0x5d   : > { %607 = vmatmul.mubr.msk.f32.vlgmr.msra.gmra.mrb[0].mxu0 %vm246_vm0, %v896_v0  ;;  %609 = vmatmul.mubr.msk.f32.vlgmr.msra.gmra.mrb[0].mxu1 %vm246_vm0, %v901_v1 }
  0x90   : > { %v239_v54 = vpop.permute.xlu0 %238 }
  0x94   : > { %v244_v55 = vpop.permute.xlu0 %243 }
 0x130   : > { %v415_v56 = vpop.f32.mrb[0].mxu0  ;;  %v421_v57 = vpop.f32.mrb[0].mxu1 }
 0x131   : > { %v416_v58 = vadd.f32 %v415_v56, %v239_v54  ;;  %v422_v59 = vadd.f32 %v421_v57, %v244_v55  ;;  %v417_v60 = vpop.f32.mrb[1].mxu0  ;;  %v423_v61 = vpop.f32.mrb[1].mxu1 }
 0x132   : > { %v418_v62 = vadd.f32 %v417_v60, %v239_v54  ;;  %v424_v63 = vadd.f32 %v423_v61, %v244_v55 }
 0x133   : > { %426 = vst [vmem:[%s188_s21] sm:$0xff] %v416_v58  ;;  %428 = vst [vmem:[%s188_s21 + $0x10] sm:$0xff] %v422_v59 }
 0x134   : > { %427 = vst [vmem:[%s188_s21 + $0x8] sm:$0xff] %v418_v62  ;;  %429 = vst [vmem:[%s188_s21 + $0x18] sm:$0xff] %v424_v63 }
 0x135   : > { %746 = shalt.err (!%p743_p5)
}
 0x136   : > { %s747_s7 = scalar_lea.hbm %s1032_s29, 512  ;;  %s751_s10 = scalar_lea.hbm %s1083_s3, 1024 }
 0x137   : > { %p748_p6 = scmp.ne.s32.totalorder %s1032_s29, %s747_s7  ;;  %p752_p10 = scmp.lt.u32.totalorder %s1032_s29, %s1083_s3 }
 0x138   : > { %p753_p11 = scmp.lt.u32.totalorder %s751_s10, %s747_s7  ;;  %p755_p13 = scmp.lt.u32.totalorder %s747_s7, %s1032_s29 }
 0x139   : > { %p749_p7 = pnand %p748_p6, %p877_p4 }
 0x13a   : > { %p754_p12 = por %p753_p11, %p752_p10 }
 0x13b   : > { %p750_p9 = pneg %p749_p7 }
 0x13c   : > { %p756_p0 = por %p755_p13, %p754_p12 }
 0x13e   : > { %p757_p1 = pnand %p756_p0, %p750_p9 }
 0x140   : > { %760 = shalt.err (!%p757_p1)
}
 0x141   : > { %s815_s19 = smov 256   ;;  %s816_s21 = smov 16  }
 0x142   : > { %674 = dma.vmem_to_hbm [thread:$0]  (%p877_p4), %s1027_s23, 512, %s1032_s29, %s1034_s15, %s815_s19, %s815_s19, %s816_s21  }
 0x143 PF: > { %p680_p2 = scmp.ge.s32.totalorder %s811_s17, 2  ;;  %s461_s26 = sand.u32 1, %s791_s12  }
 0x144   : > { %s462_s27 = scalar_lea.sflag [#allocation3], %s461_s26 }
 0x145   : > { %p677_p3 = pnand %p680_p2, %p884_p8 }
 0x147   : > { %786 = dma.done.wait (!%p677_p3), %s462_s27, 512  }
 0x148   : > { %788 = vsyncadd (!%p677_p3), %s462_s27, 4294966784  ;;  %s16_s17 = sadd.s32 1, %s811_s17   ;;  %s1088_s12 = smov %s795_s13 }
 0x149   : > { %p13_p5 = scmp.ge.s32.totalorder %s16_s17, 4   ;;  %s1089_s13 = smov %s799_s14 }
 0x14a   : > { %s1090_s14 = smov %s890_s25  ;;  %s1091_s15 = smov %s807_s16 }
 0x14b   : > { %s1092_s16 = smov %s1094_s20  ;;  %15 = sbr.rel (!%p13_p5) target bundleno = 4 (0x4), region = 67 }
 0x152   :  { %467 = vsyncpa [#allocation3], 1 }
 0x153   :  { %469 = vsyncpa [#allocation3 + $0x1], 1 }

</bundles_post_ra>
